<compile_context>
chip_gen: v7x
topology: tpu7x:2x2x1
jax: 0.10.0
libtpu: 0.0.40
codegen_flags: <defaults>
</compile_context>

<pallas_src>
import functools

import jax
import jax.numpy as jnp
from jax.experimental import pallas as pl
from jax.experimental.pallas import tpu as pltpu


def _round_up(x: int, m: int) -> int:
    return ((x + m - 1) // m) * m


# ---------------------------------------------------------------------------
# One-time capability probes (run outside jit, cached).
# ---------------------------------------------------------------------------
@functools.lru_cache(maxsize=None)
def _vmem_capacity_bytes() -> int:
    """Physical VMEM per TensorCore; falls back to the smallest (v7x) value."""
    try:
        return int(pltpu.get_tpu_info().vmem_capacity_bytes)
    except Exception:
        return 64 * 1024 * 1024


def _probe_copy_kernel(x_ref, o_ref):
    o_ref[...] = x_ref[...]


@functools.lru_cache(maxsize=None)
def _single_buffer_supported() -> bool:
    """True iff pl.Buffered(1) on a grid-invariant block compiles AND is correct."""
    try:
        fn = pl.pallas_call(
            _probe_copy_kernel,
            out_shape=jax.ShapeDtypeStruct((16, 128), jnp.float32),
            grid=(2,),
            in_specs=[pl.BlockSpec((8, 128), lambda i: (0, 0),
                                   pipeline_mode=pl.Buffered(1))],
            out_specs=pl.BlockSpec((8, 128), lambda i: (i, 0)),
        )
        x_probe = jnp.arange(8 * 128, dtype=jnp.float32).reshape(8, 128)
        y = jax.block_until_ready(fn(x_probe))
        return bool(jnp.allclose(y[:8], x_probe) and jnp.allclose(y[8:], x_probe))
    except Exception:
        return False


# ---------------------------------------------------------------------------
# Kernel
# ---------------------------------------------------------------------------
def _zero_conv_kernel(x_ref, w_ref, b_ref, o_ref):
    # x_ref: (TILE_N, C_in)  w_ref: (C_in, C_out_p)  b_ref: (1, C_out_p)
    # o_ref: (TILE_N, C_out_p)
    acc = jnp.dot(x_ref[...], w_ref[...], preferred_element_type=jnp.float32)
    # K (C_in) is NOT tiled, so the bias add runs exactly once per output tile.
    # (If a K grid axis is ever added, gate this with pl.when(k == 0).)
    o_ref[...] = (acc + b_ref[...]).astype(o_ref.dtype)


# ---------------------------------------------------------------------------
# Parameter prep (hoisted out of the forward)
# ---------------------------------------------------------------------------
def prepare_zero_conv_params(weight, bias):
    """One-time prep: slice the k=1 conv weight, transpose to (C_in, C_out) so
    the MXU sees canonical (K, N), and pad C_out to a 128 multiple so output
    stores are lane-dense (unmasked)."""
    c_out, c_in = int(weight.shape[0]), int(weight.shape[1])
    c_out_p = _round_up(c_out, 128)
    w_t = jnp.transpose(weight[:, :, 0])                       # (C_in, C_out)
    w_t = jnp.pad(w_t, ((0, 0), (0, c_out_p - c_out)))         # (C_in, C_out_p)
    b_row = jnp.pad(bias, (0, c_out_p - c_out)).reshape(1, c_out_p)
    return w_t, b_row, c_out


# ---------------------------------------------------------------------------
# Forward
# ---------------------------------------------------------------------------
@functools.partial(
    jax.jit, static_argnames=("c_out", "tile_n_cap", "single_buffer_weights"))
def _zero_conv2d_impl(x, w_t, b_row, *, c_out, tile_n_cap, single_buffer_weights):
    n, c_in = x.shape
    c_in_w, c_out_p = w_t.shape
    if c_in_w != c_in:
        raise ValueError(f"C_in mismatch: x has {c_in}, weight has {c_in_w}")

    # ---- VMEM budgeting (generation-aware via physical capacity) -------------
    scoped_cap = (3 * _vmem_capacity_bytes()) // 4   # ~48 MiB v7x, ~96 MiB v5e/v6e
    w_buffers = 1 if single_buffer_weights else 2    # pipeliner may double-buffer
    weight_bytes = w_buffers * 4 * (c_in * c_out_p + c_out_p)
    per_row_bytes = 2 * 4 * (c_in + c_out_p)         # double-buffered x + out tiles
    budget = scoped_cap - 4 * 1024 * 1024
    max_rows = max(8, (budget - weight_bytes) // per_row_bytes)
    # TODO(synk): if the resident weight alone exceeds the budget (very large
    # C_in*C_out), add a C_out grid axis instead of letting tile_n collapse.

    # ---- batch tile size ------------------------------------------------------
    tile_n = min(tile_n_cap, max_rows)
    if n > 8:
        # v7x megacore: keep >= 2 grid steps so both TensorCores get work
        # (neutral on single-TC v5e/v6e).
        tile_n = min(tile_n, _round_up(pl.cdiv(n, 2), 8))
    tile_n = max(8, (tile_n // 8) * 8)               # f32 sublane multiple
    tile_n = min(tile_n, _round_up(n, 8))

    grid = (pl.cdiv(n, tile_n),)  # ragged last block: OOB rows are masked on store
    footprint = weight_bytes + per_row_bytes * tile_n
    vmem_limit = int(min(scoped_cap,
                         max(32 * 1024 * 1024, footprint + 4 * 1024 * 1024)))

    resident = dict(pipeline_mode=pl.Buffered(1)) if single_buffer_weights else {}

    cost = pl.CostEstimate(
        flops=2 * n * c_in * c_out_p,
        bytes_accessed=4 * (n * c_in + c_in * c_out_p + c_out_p + n * c_out_p),
        transcendentals=0,
    )

    out = pl.pallas_call(
        _zero_conv_kernel,
        out_shape=jax.ShapeDtypeStruct((n, c_out_p), x.dtype),
        grid_spec=pltpu.PrefetchScalarGridSpec(
            num_scalar_prefetch=0,
            grid=grid,
            in_specs=[
                pl.BlockSpec((tile_n, c_in), lambda i: (i, 0)),              # streamed
                pl.BlockSpec((c_in, c_out_p), lambda i: (0, 0), **resident),  # resident
                pl.BlockSpec((1, c_out_p), lambda i: (0, 0), **resident),     # resident
            ],
            out_specs=pl.BlockSpec((tile_n, c_out_p), lambda i: (i, 0)),
        ),
        compiler_params=pltpu.CompilerParams(
            dimension_semantics=("parallel",),   # shards batch tiles over 2 TCs on v7x
            vmem_limit_bytes=vmem_limit,
        ),
        cost_estimate=cost,
    )(x, w_t, b_row)

    # TODO(synk): optionally cast x / w_t to bfloat16 (keeping f32 accumulation)
    # to halve streamed HBM bytes, gated on model-accuracy requirements.

    if c_out_p != c_out:
        out = out[:, :c_out]
    return out


def zero_conv2d_forward(x, weight, bias, *, tile_n_cap: int = 2048):
    """Convenience entry point taking the raw PyTorch-layout parameters.
    Note: param prep runs per call here; use ZeroConv2dJax to hoist it to init."""
    w_t, b_row, c_out = prepare_zero_conv_params(weight, bias)
    return _zero_conv2d_impl(
        x, w_t, b_row, c_out=c_out, tile_n_cap=tile_n_cap,
        single_buffer_weights=_single_buffer_supported())


class ZeroConv2dJax:
    """Mirrors the PyTorch __init__: all parameters zero-initialized.
    Weight/bias prep is hoisted to init so the forward only runs the kernel."""

    def __init__(self, in_channel, out_channel, padding=1):
        self.weight = jnp.zeros((out_channel, in_channel, 1), jnp.float32)  # conv.weight
        self.bias = jnp.zeros((out_channel,), jnp.float32)                  # conv.bias
        self.scale = jnp.zeros((1, out_channel, 1, 1), jnp.float32)         # unused in forward
        self._w_t, self._b_row, self._c_out = prepare_zero_conv_params(
            self.weight, self.bias)

    def __call__(self, x, *, tile_n_cap: int = 2048):
        return _zero_conv2d_impl(
            x, self._w_t, self._b_row,
            c_out=self._c_out, tile_n_cap=tile_n_cap,
            single_buffer_weights=_single_buffer_supported())


if __name__ == "__main__":
    key = jax.random.PRNGKey(0)

    # --- 1) kernel correctness with RANDOM params.  Odd sizes exercise:
    #        * unpadded C_in block (block last dim == full array dim),
    #        * padded (lane-dense) C_out with final column slice,
    #        * the ragged last batch block (n=10, tile_n=8 -> grid=(2,), rows
    #          10..15 of the last block are OOB and must be masked on store).
    kx, kw, kb = jax.random.split(key, 3)
    n, c_in, c_out = 10, 12, 20
    x_r = jax.random.normal(kx, (n, c_in), dtype=jnp.float32)
    w_r = jax.random.normal(kw, (c_out, c_in, 1), dtype=jnp.float32)
    b_r = jax.random.normal(kb, (c_out,), dtype=jnp.float32)

    out_r = jax.block_until_ready(zero_conv2d_forward(x_r, w_r, b_r))
    ref_r = x_r @ jnp.transpose(w_r[:, :, 0]) + b_r[None, :]
    assert out_r.shape == (n, c_out)
    assert jnp.allclose(out_r, ref_r, atol=1e-4), float(jnp.max(jnp.abs(out_r - ref_r)))

    # --- 2) the module itself (zero-initialized params -> all-zero output) -----
    batch, in_channel, out_channel = 8, 32, 32
    x = jax.random.normal(key, (batch, in_channel), dtype=jnp.float32)
    module = ZeroConv2dJax(in_channel, out_channel)
    out = jax.block_until_ready(module(x))
    assert out.shape == (batch, out_channel)
    assert jnp.allclose(out, jnp.zeros_like(out))

    print("KERNEL_OK")
</pallas_src>

<mosaic_0001>
module attributes {stable_mosaic.version = 11 : i64} {
  func.func @_probe_copy_kernel(%arg0: i32, %arg1: memref<8x128xf32, #tpu.memory_space<vmem>>, %arg2: memref<8x128xf32, #tpu.memory_space<vmem>>) attributes {dimension_semantics = [#tpu.dimension_semantics<arbitrary>], iteration_bounds = array<i64: 2>, scalar_prefetch = 0 : i64, scratch_operands = 0 : i64, tpu.core_type = #tpu.core_type<tc>, window_params = [{pipeline_mode = #tpu.pipeline_mode<synchronous>, transform_indices = @transform_0, window_bounds = array<i64: 8, 128>}, {transform_indices = @transform_1, window_bounds = array<i64: 8, 128>}]} {
    %c0 = arith.constant 0 : index
    %c0_0 = arith.constant 0 : index
    %0 = vector.load %arg1[%c0, %c0_0] : memref<8x128xf32, #tpu.memory_space<vmem>>, vector<8x128xf32>
    %c0_1 = arith.constant 0 : index
    %c0_2 = arith.constant 0 : index
    %1 = vector.load %arg2[%c0_1, %c0_2] : memref<8x128xf32, #tpu.memory_space<vmem>>, vector<8x128xf32>
    tpu.vector_store %arg2[%c0_1, %c0_2], %0 {strides = array<i32>} : memref<8x128xf32, #tpu.memory_space<vmem>>, vector<8x128xf32>,
    return
  }
  func.func @transform_0(%arg0: i32) -> (i32, i32) {
    %c0_i32 = arith.constant 0 : i32
    %c0_i32_0 = arith.constant 0 : i32
    %c0_i32_1 = arith.constant 0 : i32
    return %c0_i32, %c0_i32_0 : i32, i32
  }
  func.func @transform_1(%arg0: i32) -> (i32, i32) {
    %c0_i32 = arith.constant 0 : i32
    %c0_i32_0 = arith.constant 0 : i32
    return %arg0, %c0_i32 : i32, i32
  }
}

module attributes {stable_mosaic.version = 11 : i64} {
  func.func @_zero_conv_kernel(%arg0: i32, %arg1: memref<8x12xf32, #tpu.memory_space<vmem>>, %arg2: memref<12x128xf32, #tpu.memory_space<vmem>>, %arg3: memref<1x128xf32, #tpu.memory_space<vmem>>, %arg4: memref<8x128xf32, #tpu.memory_space<vmem>>) attributes {dimension_semantics = [#tpu.dimension_semantics<parallel>], iteration_bounds = array<i64: 2>, scalar_prefetch = 0 : i64, scratch_operands = 0 : i64, tpu.core_type = #tpu.core_type<tc>, window_params = [{transform_indices = @transform_0, window_bounds = array<i64: 8, 12>}, {pipeline_mode = #tpu.pipeline_mode<synchronous>, transform_indices = @transform_1, window_bounds = array<i64: 12, 128>}, {pipeline_mode = #tpu.pipeline_mode<synchronous>, transform_indices = @transform_2, window_bounds = array<i64: 1, 128>}, {transform_indices = @transform_3, window_bounds = array<i64: 8, 128>}]} {
    %c0 = arith.constant 0 : index
    %c0_0 = arith.constant 0 : index
    %0 = vector.load %arg1[%c0, %c0_0] : memref<8x12xf32, #tpu.memory_space<vmem>>, vector<8x12xf32>
    %c0_1 = arith.constant 0 : index
    %c0_2 = arith.constant 0 : index
    %1 = vector.load %arg2[%c0_1, %c0_2] : memref<12x128xf32, #tpu.memory_space<vmem>>, vector<12x128xf32>
    %cst = arith.constant dense<0.000000e+00> : vector<8x128xf32>
    %2 = tpu.matmul %0, %1, %cst {dimension_numbers = #tpu.dot_dimension_numbers<[1], [0], [0], [1], [0, 0, 1, 1], [], []>} : vector<8x12xf32>, vector<12x128xf32>, vector<8x128xf32> -> vector<8x128xf32>
    %c0_3 = arith.constant 0 : index
    %c0_4 = arith.constant 0 : index
    %3 = vector.load %arg3[%c0_3, %c0_4] : memref<1x128xf32, #tpu.memory_space<vmem>>, vector<1x128xf32>
    %4 = vector.broadcast %3 : vector<1x128xf32> to vector<8x128xf32>
    %5 = arith.addf %2, %4 : vector<8x128xf32>
    %c0_5 = arith.constant 0 : index
    %c0_6 = arith.constant 0 : index
    %6 = vector.load %arg4[%c0_5, %c0_6] : memref<8x128xf32, #tpu.memory_space<vmem>>, vector<8x128xf32>
    tpu.vector_store %arg4[%c0_5, %c0_6], %5 {strides = array<i32>} : memref<8x128xf32, #tpu.memory_space<vmem>>, vector<8x128xf32>,
    return
  }
  func.func @transform_0(%arg0: i32) -> (i32, i32) {
    %c0_i32 = arith.constant 0 : i32
    %c0_i32_0 = arith.constant 0 : i32
    return %arg0, %c0_i32 : i32, i32
  }
  func.func @transform_1(%arg0: i32) -> (i32, i32) {
    %c0_i32 = arith.constant 0 : i32
    %c0_i32_0 = arith.constant 0 : i32
    %c0_i32_1 = arith.constant 0 : i32
    return %c0_i32, %c0_i32_0 : i32, i32
  }
  func.func @transform_2(%arg0: i32) -> (i32, i32) {
    %c0_i32 = arith.constant 0 : i32
    %c0_i32_0 = arith.constant 0 : i32
    %c0_i32_1 = arith.constant 0 : i32
    return %c0_i32, %c0_i32_0 : i32, i32
  }
  func.func @transform_3(%arg0: i32) -> (i32, i32) {
    %c0_i32 = arith.constant 0 : i32
    %c0_i32_0 = arith.constant 0 : i32
    return %arg0, %c0_i32 : i32, i32
  }
}

</mosaic_0001>

<bundles_post_ra>
// kernel: tpu_custom_call.1
= control target key start
LH: loop header
LB: loop body
LE: loop exit
PB: predicated region body
PF: predicated region fallthrough
CT: control target
= control target key end

     0   :  { %6 = vsyncpa [#allocation3], 0  ;;  %s481_s0 = inlined_call_operand.hbm [shape: f32[8,128], index: 0, kind: input, shape index: {}]   ;;  %s482_s1 = inlined_call_operand.hbm [shape: f32[16,128], index: 1, kind: output, shape index: {}]  }
   0x1   :  { %7 = vsyncpa [#allocation4], 0 }
   0x2   :  { %9 = vsyncpa [#allocation4 + $0x1], 0  ;;  %s351_s6 = smov 0   ;;  %s353_s7 = smov 0  }
   0x3   :  { %s355_s8 = smov 0   ;;  %s357_s9 = smov 0  }
   0x4 LB: > { %s372_s10 = sadd.s32 4294967295, %s337_s9   ;;  %s183_s11 = sadd.s32 4294967294, %s337_s9   ;;  %s337_s9 = sphi %s357_s9, %s498_s9   ;;  %s333_s8 = sphi %s355_s8, %s497_s8   ;;  %s329_s7 = sphi %s353_s7, %s496_s7   ;;  %s325_s6 = sphi %s351_s6, %s495_s6  }
   0x5   : > { %s376_s12 = sadd.s32 1, %s337_s9   ;;  %s43_s13 = sadd.s32 1, %s333_s8 }
   0x6   : > { %s40_s14 = ssub.s32 %s337_s9, %s376_s12  ;;  %p53_p0 = scmp.ne.s32.totalorder %s333_s8, %s329_s7 }
   0x7   : > { %p41_p1 = scmp.eq.s32.totalorder %s40_s14, 0  ;;  %p54_p2 = scmp.eq.s32.totalorder %s372_s10, 1 }
   0x8   : > { %p59_p3 = scmp.ne.s32.totalorder %s329_s7, %s325_s6  ;;  %p60_p4 = scmp.eq.s32.totalorder %s183_s11, 1 }
   0x9   : > { %s387_s15 = scalar_select %p41_p1, %s333_s8, %s43_s13  }
   0xa   : > { %p389_p5 = por %p54_p2, %p53_p0  ;;  %p393_p6 = por %p60_p4, %p59_p3 }
   0xb   : > { %p184_p7 = scmp.ge.s32.totalorder %s337_s9, 1  ;;  %p67_p8 = scmp.lt.s32.totalorder %s337_s9, 3 }
   0xc   : > { %s486_s16 = scalar_select %p389_p5, 1, 0 }
   0xd   : > { %s487_s17 = scalar_select %p393_p6, 1, 0 }
   0xe   : > { %p483_p9 = scmp.eq.s32.totalorder %s372_s10, 0  ;;  %p400_p10 = pnand %p184_p7, %p67_p8 }
   0xf   : > { %s339_s19 = smov [#allocation2]   ;;  %s243_s24 = scalar_lea.hbm %s481_s0, 128 }
  0x10   : > { %s488_s18 = scalar_select %p400_p10, 1, 0 }
  0x11   : > { %s80_s20 = sshll.u32 %s339_s19, 4  ;;  %p199_p11 = pneg %p400_p10  ;;  %s81_s20 = int_to_ptr.vmem [resolvable:$true] %s80_s20 }
  0x12   : > { %p244_p13 = scmp.ne.s32.totalorder %s481_s0, %s243_s24  ;;  %p250_p3 = scmp.lt.u32.totalorder %s243_s24, %s481_s0 }
  0x13   : > { %p408_p12 = pnand %p483_p9, %p199_p11 }
  0x15   : > { %p245_p0 = pneg %p408_p12 }
  0x17   : > { %p246_p1 = pnand %p245_p0, %p244_p13 }
  0x19   : > { %p247_p2 = pneg %p246_p1 }
  0x1b   : > { %p252_p4 = pnand %p250_p3, %p247_p2 }
  0x1d   : > { %255 = shalt.err (!%p252_p4)
}
  0x1e   : > { %s256_s29 = scalar_lea.vmem %s81_s20, 128  ;;  %p264_p9 = scmp.lt.s32.totalorder %s81_s20, %s81_s20 }
  0x1f   : > { %p257_p7 = scmp.ne.s32.totalorder %s81_s20, %s256_s29  ;;  %p265_p6 = scmp.lt.s32.totalorder %s256_s29, %s256_s29 }
  0x21   : > { %p259_p8 = pnand %p257_p7, %p245_p0  ;;  %p266_p5 = por %p265_p6, %p264_p9 }
  0x23   : > { %p260_p11 = pneg %p259_p8 }
  0x25   : > { %p267_p10 = pnand %p266_p5, %p260_p11 }
  0x27   : > { %270 = shalt.err (!%p267_p10)
}
  0x28   : > { %202 = dma.hbm_to_vmem [thread:$0]  (!%p408_p12), %s481_s0, 128, %s81_s20, [#allocation3]  }
  0x29   : > { %p490_p13 = scmp.ne.s32.totalorder %s488_s18, 0 }
  0x2a   : > { %p491_p1 = scmp.eq.s32.totalorder (!%p490_p13), %s372_s10, 0 }
  0x2b   : > { %93 = sbr.rel (%p490_p13) target bundleno = 77 (0x4d), region = 24 }
  0x32   : > { %316 = dma.done.wait (%p491_p1), [#allocation3], 128   ;;  %p492_p0 = pmov %p491_p1 }
  0x33   : > { %s105_s3 = sand.u32 1, %s329_s7   ;;  %s190_s13 = sshll.u32 %s372_s10, 7  ;;  %v108_v0 = vld [vmem:[#allocation2] sm:$0xff] }
  0x34   : > { %318 = vsyncadd (%p492_p0), [#allocation3], 4294967168  ;;  %s188_s4 = sshll.u32 %s105_s3, 3  ;;  %s441_s18 = scalar_lea.hbm %s482_s1, %s190_s13 }
  0x35   : > { %s107_s5 = scalar_lea.vmem [#allocation5], %s188_s4  ;;  %s111_s20 = scalar_lea.sflag [#allocation4], %s105_s3 }
  0x36   : > { %s124_s11 = sshll.u32 %s107_s5, 4  ;;  %109 = vst [vmem:[%s107_s5] sm:$0xff] %v108_v0  ;;  %p493_p6 = scmp.ne.s32.totalorder %s486_s16, 0  ;;  %s436_s11 = int_to_ptr.vmem [resolvable:$true] %s124_s11 }
  0x37   : > { %s271_s21 = scalar_lea.vmem %s436_s11, 128  ;;  %s340_s22 = smov [#allocation5]  }
  0x38   : > { %p272_p5 = scmp.ne.s32.totalorder %s436_s11, %s271_s21  ;;  %s275_s10 = sshll.u32 %s340_s22, 4  ;;  %s276_s10 = int_to_ptr.vmem [resolvable:$false] %s275_s10 }
  0x39   : > { %s277_s23 = scalar_lea.vmem %s276_s10, 256  ;;  %p278_p12 = scmp.lt.s32.totalorder %s436_s11, %s276_s10 }
  0x3a   : > { %p273_p9 = pnand %p272_p5, %p493_p6  ;;  %p279_p2 = scmp.lt.s32.totalorder %s277_s23, %s271_s21 }
  0x3c   : > { %p274_p10 = pneg %p273_p9  ;;  %p280_p3 = por %p279_p2, %p278_p12 }
  0x3e   : > { %p281_p4 = pnand %p280_p3, %p274_p10 }
  0x40   : > { %284 = shalt.err (!%p281_p4)
}
  0x41   : > { %s285_s24 = scalar_lea.hbm %s441_s18, 128  ;;  %s289_s27 = scalar_lea.hbm %s482_s1, 256 }
  0x42   : > { %p286_p7 = scmp.ne.s32.totalorder %s441_s18, %s285_s24  ;;  %p290_p13 = scmp.lt.u32.totalorder %s441_s18, %s482_s1 }
  0x43   : > { %p291_p1 = scmp.lt.u32.totalorder %s289_s27, %s285_s24  ;;  %p293_p5 = scmp.lt.u32.totalorder %s285_s24, %s441_s18 }
  0x44   : > { %p287_p8 = pnand %p286_p7, %p493_p6 }
  0x45   : > { %p292_p0 = por %p291_p1, %p290_p13 }
  0x46   : > { %p288_p11 = pneg %p287_p8 }
  0x47   : > { %p294_p9 = por %p293_p5, %p292_p0 }
  0x49   : > { %p295_p10 = pnand %p294_p9, %p288_p11 }
  0x4b   : > { %298 = shalt.err (!%p295_p10)
}
  0x4c   : > { %197 = dma.vmem_to_hbm [thread:$0]  (%p493_p6), %s436_s11, 128, %s441_s18, %s111_s20  }
  0x4d PF: > { %p209_p12 = scmp.ge.s32.totalorder %s337_s9, 2  ;;  %s136_s30 = sand.u32 1, %s325_s6  }
  0x4e   : > { %p494_p2 = scmp.ne.s32.totalorder %s487_s17, 0  ;;  %s137_s2 = scalar_lea.sflag [#allocation4], %s136_s30 }
  0x50   : > { %p204_p3 = pnand %p209_p12, %p494_p2 }
  0x52   : > { %320 = dma.done.wait (!%p204_p3), %s137_s2, 128  }
  0x53   : > { %322 = vsyncadd (!%p204_p3), %s137_s2, 4294967168  ;;  %p12_p4 = scmp.ge.s32.totalorder %s376_s12, 4   ;;  %s495_s6 = smov %s329_s7 }
  0x54   : > { %s496_s7 = smov %s333_s8  ;;  %s497_s8 = smov %s387_s15 }
  0x55   : > { %s498_s9 = smov %s376_s12  ;;  %14 = sbr.rel (!%p12_p4) target bundleno = 4 (0x4), region = 61 }
  0x5c   :  { %142 = vsyncpa [#allocation3], 1 }
  0x5d   :  { %144 = vsyncpa [#allocation3 + $0x1], 1 }
  0x5e   :  { %145 = vsyncpa [#allocation4], 1 }
  0x5f   :  { %147 = vsyncpa [#allocation4 + $0x1], 1 }

// kernel: _zero_conv2d_impl.1
= control target key start
LH: loop header
LB: loop body
LE: loop exit
PB: predicated region body
PF: predicated region fallthrough
CT: control target
= control target key end

     0   :  { %8 = vsyncpa [#allocation3], 0  ;;  %s836_s0 = inlined_call_operand.hbm [shape: f32[10,12], index: 0, kind: input, shape index: {}]   ;;  %s837_s1 = inlined_call_operand.hbm [shape: f32[12,128], index: 1, kind: input, shape index: {}]   ;;  %s838_s2 = inlined_call_operand.vmem [shape: f32[1,128], index: 2, kind: input, shape index: {}]   ;;  %s839_s3 = inlined_call_operand.hbm [shape: f32[10,128], index: 3, kind: output, shape index: {}]  }
   0x1   :  { %10 = vsyncpa [#allocation3 + $0x1], 0 }
   0x2   :  { %11 = vsyncpa [#allocation6], 0 }
   0x3   :  { %12 = vsyncpa [#allocation4], 0 }
   0x4   :  { %14 = vsyncpa [#allocation4 + $0x1], 0  ;;  %s637_s12 = smov 0   ;;  %s639_s13 = smov 0  }
   0x5   :  { %s641_s14 = smov 0   ;;  %s643_s15 = smov 0  }
   0x6 LB: > { %s658_s16 = sadd.s32 4294967295, %s606_s15   ;;  %s384_s17 = sadd.s32 4294967294, %s606_s15   ;;  %s606_s15 = sphi %s643_s15, %s859_s15   ;;  %s602_s14 = sphi %s641_s14, %s858_s14   ;;  %s598_s13 = sphi %s639_s13, %s857_s13   ;;  %s594_s12 = sphi %s637_s12, %s856_s12  }
   0x7   : > { %p40_p0 = scmp.ne.s32.totalorder %s598_s13, %s594_s12  ;;  %p840_p1 = scmp.eq.s32.totalorder %s658_s16, 0 }
   0x8   : > { %p112_p3 = scmp.eq.s32.totalorder %s384_s17, 1  ;;  %p385_p5 = scmp.ge.s32.totalorder %s606_s15, 1 }
   0x9   : > { %p667_p4 = por %p840_p1, %p40_p0  ;;  %p119_p7 = scmp.lt.s32.totalorder %s606_s15, 3 }
   0xa   : > { %p672_p6 = por %p112_p3, %p40_p0  ;;  %s608_s21 = smov [#allocation5]  }
   0xb   : > { %s843_s18 = scalar_select %p667_p4, 1, 0 }
   0xc   : > { %s844_s19 = scalar_select %p672_p6, 1, 0 }
   0xd   : > { %p677_p8 = pnand %p385_p5, %p119_p7  ;;  %s131_s22 = sshll.u32 %s608_s21, 4  ;;  %s681_s22 = int_to_ptr.vmem [resolvable:$true] %s131_s22 }
   0xe   : > { %s693_s24 = sadd.s32 1, %s606_s15   ;;  %s27_s25 = sadd.s32 1, %s602_s14 }
   0xf   : > { %s845_s20 = scalar_select %p677_p8, 1, 0 }
  0x10   : > { %p423_p9 = pneg %p677_p8  ;;  %s24_s26 = ssub.s32 %s606_s15, %s693_s24 }
  0x11   : > { %s478_s29 = scalar_lea.hbm %s837_s1, 256 }
  0x12   : > { %p688_p11 = pnand %p423_p9, %p840_p1  ;;  %p479_p12 = scmp.ne.s32.totalorder %s837_s1, %s478_s29 }
  0x13   : > { %p485_p5 = scmp.lt.u32.totalorder %s478_s29, %s837_s1 }
  0x14   : > { %p480_p13 = pneg %p688_p11 }
  0x16   : > { %p481_p0 = pnand %p480_p13, %p479_p12 }
  0x18   : > { %p482_p3 = pneg %p481_p0 }
  0x1a   : > { %p487_p7 = pnand %p485_p5, %p482_p3 }
  0x1c   : > { %490 = shalt.err (!%p487_p7)
}
  0x1d   : > { %s491_s7 = scalar_lea.vmem %s681_s22, 256  ;;  %p499_p2 = scmp.lt.s32.totalorder %s681_s22, %s681_s22 }
  0x1e   : > { %p492_p9 = scmp.ne.s32.totalorder %s681_s22, %s491_s7  ;;  %p500_p6 = scmp.lt.s32.totalorder %s491_s7, %s491_s7 }
  0x20   : > { %p494_p10 = pnand %p492_p9, %p480_p13  ;;  %p501_p4 = por %p500_p6, %p499_p2 }
  0x22   : > { %p495_p1 = pneg %p494_p10 }
  0x24   : > { %p502_p8 = pnand %p501_p4, %p495_p1 }
  0x26   : > { %505 = shalt.err (!%p502_p8)
}
  0x27   : > { %s609_s8 = smov 128   ;;  %s610_s9 = smov 8  }
  0x28   : > { %426 = dma.hbm_to_vmem [thread:$0]  (!%p688_p11), %s837_s1, 256, %s681_s22, [#allocation6], %s609_s8, %s609_s8, %s610_s9  }
  0x29   : > { %p25_p2 = scmp.eq.s32.totalorder %s24_s26, 0  ;;  %p34_p1 = scmp.ne.s32.totalorder %s602_s14, %s598_s13 }
  0x2a   : > { %p35_p4 = scmp.eq.s32.totalorder %s606_s15, 0  ;;  %p436_p6 = scmp.lt.s32.totalorder %s606_s15, 2 }
  0x2b   : > { %s724_s17 = scalar_select %p25_p2, %s602_s14, %s27_s25  }
  0x2c   : > { %p36_p8 = por %p35_p4, %p34_p1  ;;  %p847_p10 = scmp.eq.s32.totalorder %s658_s16, 1 }
  0x2d   : > { %s148_s27 = sand.u32 1, %s602_s14   ;;  %s389_s28 = sshll.u32 %s606_s15, 7 }
  0x2e   : > { %p728_p12 = por %p847_p10, %p34_p1  ;;  %s388_s29 = sshll.u32 %s148_s27, 3 }
  0x2f   : > { %s737_s4 = scalar_lea.hbm %s836_s0, %s389_s28  ;;  %s152_s22 = scalar_lea.vmem [#allocation2], %s388_s29 }
  0x30   : > { %s159_s25 = sshll.u32 %s152_s22, 4  ;;  %p739_p11 = pnand %p436_p6, %p36_p8  ;;  %s743_s25 = int_to_ptr.vmem [resolvable:$true] %s159_s25 }
  0x31   : > { %s149_s5 = scalar_lea.sflag [#allocation3], %s148_s27  ;;  %s506_s6 = scalar_lea.hbm %s737_s4, 128 }
  0x32   : > { %p507_p13 = scmp.ne.s32.totalorder %s737_s4, %s506_s6  ;;  %p508_p0 = pneg %p739_p11 }
  0x33   : > { %s511_s9 = scalar_lea.hbm %s836_s0, 256  ;;  %p512_p7 = scmp.lt.u32.totalorder %s737_s4, %s836_s0 }
  0x34   : > { %p509_p3 = pnand %p508_p0, %p507_p13  ;;  %p513_p9 = scmp.lt.u32.totalorder %s511_s9, %s506_s6 }
  0x35   : > { %p515_p1 = scmp.lt.u32.totalorder %s506_s6, %s737_s4 }
  0x36   : > { %p510_p5 = pneg %p509_p3  ;;  %p514_p2 = por %p513_p9, %p512_p7 }
  0x38   : > { %p516_p4 = por %p515_p1, %p514_p2 }
  0x3a   : > { %p517_p6 = pnand %p516_p4, %p510_p5 }
  0x3c   : > { %520 = shalt.err (!%p517_p6)
}
  0x3d   : > { %s521_s27 = scalar_lea.vmem %s743_s25, 128  ;;  %s611_s28 = smov [#allocation2]  }
  0x3e   : > { %p522_p8 = scmp.ne.s32.totalorder %s743_s25, %s521_s27  ;;  %s526_s29 = sshll.u32 %s611_s28, 4  ;;  %s527_s29 = int_to_ptr.vmem [resolvable:$false] %s526_s29 }
  0x3f   : > { %s528_s23 = scalar_lea.vmem %s527_s29, 256  ;;  %p529_p3 = scmp.lt.s32.totalorder %s743_s25, %s527_s29 }
  0x40   : > { %p524_p10 = pnand %p522_p8, %p508_p0  ;;  %p530_p7 = scmp.lt.s32.totalorder %s528_s23, %s521_s27 }
  0x42   : > { %p525_p13 = pneg %p524_p10  ;;  %p531_p9 = por %p530_p7, %p529_p3 }
  0x44   : > { %p532_p2 = pnand %p531_p9, %p525_p13 }
  0x46   : > { %535 = shalt.err (!%p532_p2)
}
  0x47   : > { %430 = dma.hbm_to_vmem [thread:$0]  (!%p739_p11), %s737_s4, 128, %s743_s25, %s149_s5  }
  0x48   : > { %p850_p5 = scmp.ne.s32.totalorder %s845_s20, 0 }
  0x49   : > { %s773_s30 = sand.u32 (!%p850_p5), 1, %s598_s13   ;;  %p851_p0 = scmp.ne.s32.totalorder (!%p850_p5), %s843_s18, 0 }
  0x4a   : > { %168 = sbr.rel (%p850_p5) target bundleno = 320 (0x140), region = 32  ;;  %s391_s22 = sshll.u32 (!%p850_p5), %s773_s30, 3 }
  0x4b   : > { %s171_s6 = scalar_lea.sflag (!%p850_p5), [#allocation3], %s773_s30  ;;  %s174_s7 = scalar_lea.vmem (!%p850_p5), [#allocation2], %s391_s22 }
  0x51   : > { %581 = dma.done.wait (%p851_p0), %s171_s6, 128  }
  0x52   : > { %583 = vsyncadd (%p851_p0), %s171_s6, 4294967168  ;;  %p852_p1 = scmp.eq.s32.totalorder %s658_s16, 0 }
  0x54   : > { %585 = dma.done.wait (%p852_p1), [#allocation6], 256   ;;  %p853_p11 = pmov %p852_p1 }
  0x55   : > { %v612_v0 = vmov 0.0|0.0   ;;  %vm613_vm0 = vmmov 0   ;;  %v614_v1 = vmov 0.0   ;;  %vm215_vm1 = vcmask 1043456   ;;  %v202_v2 = vld [vmem:[#allocation5] sm:$0xff]  ;;  %v201_v5 = vld [vmem:[%s174_s7] sm:$0xff] }
  0x56   : > { %587 = vsyncadd (%p853_p11), [#allocation6], 4294967040  ;;  %411 = vmatprep.subr.bf16.mxu0 %v612_v0  ;;  %408 = vmatprep.mubr.msk.f32.mxu0 %vm613_vm0, %v614_v1  ;;  %v203_v3 = vld [vmem:[#allocation5 + $0x8] sm:$0xf]  ;;  %vm615_vm2 = vmmov 1   ;;  %vm211_vm4 = vcmask 97280  }
  0x57   : > { %vm413_vm3 = vmpackc.low %vm215_vm1, %vm615_vm2  ;;  %v412_v4 = vpack.c.bf16 %v203_v3, %v202_v2  ;;  %v394_v6 = vld [vmem:[%s838_s2] ss:$0 sm:$0xff]  ;;  %s398_s4 = sshll.u32 %s658_s16, 7  ;;  %s200_s25 = scalar_lea.vmem [#allocation7], %s391_s22 }
  0x58   : > { %s304_s26 = sshll.u32 %s200_s25, 4  ;;  %s792_s9 = scalar_lea.hbm %s839_s3, %s398_s4  ;;  %s794_s26 = int_to_ptr.vmem [resolvable:$true] %s304_s26 }
  0x59   : > { %414 = vmatpush3.bf16.msk.msra.mxu0 %vm413_vm3, %v412_v4  ;;  %s291_s10 = scalar_lea.sflag [#allocation4], %s773_s30  ;;  %s536_s11 = scalar_lea.vmem %s794_s26, 128 }
  0x5a   : > { %p537_p4 = scmp.ne.s32.totalorder %s794_s26, %s536_s11  ;;  %s616_s16 = smov [#allocation7]  }
  0x5b   : > { %s540_s27 = sshll.u32 %s616_s16, 4  ;;  %s541_s27 = int_to_ptr.vmem [resolvable:$false] %s540_s27 }
  0x5c   : > { %409 = vmatmul.mubr.msk.f32.vlgmr.msra.gmra.mrb[0].mxu0 %vm211_vm4, %v201_v5  ;;  %p538_p6 = pnand %p537_p4, %p728_p12  ;;  %s542_s28 = scalar_lea.vmem %s541_s27, 256 }
  0x5d   : > { %p543_p10 = scmp.lt.s32.totalorder %s794_s26, %s541_s27  ;;  %p544_p13 = scmp.lt.s32.totalorder %s542_s28, %s536_s11 }
  0x5e   : > { %p539_p8 = pneg %p538_p6 }
  0x5f   : > { %p545_p3 = por %p544_p13, %p543_p10 }
  0x61   : > { %p546_p7 = pnand %p545_p3, %p539_p8 }
 0x12f   : > { %v285_v7 = vpop.f32.mrb[0].mxu0 }
 0x130   : > { %v286_v8 = vadd.f32 %v394_v6, %v285_v7  ;;  %v410_v9 = vpop.f32.mrb[1].mxu0 }
 0x132   : > { %289 = vst [vmem:[%s200_s25] sm:$0xff] %v286_v8 }
 0x133   : > { %549 = shalt.err (!%p546_p7)
}
 0x134   : > { %s550_s29 = scalar_lea.hbm %s792_s9, 128  ;;  %s554_s22 = scalar_lea.hbm %s839_s3, 256 }
 0x135   : > { %p551_p9 = scmp.ne.s32.totalorder %s792_s9, %s550_s29  ;;  %p555_p0 = scmp.lt.u32.totalorder %s792_s9, %s839_s3 }
 0x136   : > { %p556_p1 = scmp.lt.u32.totalorder %s554_s22, %s550_s29  ;;  %p558_p4 = scmp.lt.u32.totalorder %s550_s29, %s792_s9 }
 0x137   : > { %p552_p2 = pnand %p551_p9, %p728_p12 }
 0x138   : > { %p557_p11 = por %p556_p1, %p555_p0 }
 0x139   : > { %p553_p5 = pneg %p552_p2 }
 0x13a   : > { %p559_p6 = por %p558_p4, %p557_p11 }
 0x13c   : > { %p560_p8 = pnand %p559_p6, %p553_p5 }
 0x13e   : > { %563 = shalt.err (!%p560_p8)
}
 0x13f   : > { %421 = dma.vmem_to_hbm [thread:$0]  (%p728_p12), %s794_s26, 128, %s792_s9, %s291_s10  }
 0x140 PF: > { %s316_s18 = sand.u32 1, %s594_s12   ;;  %p854_p10 = scmp.ne.s32.totalorder %s844_s19, 0 }
 0x141   : > { %p855_p13 = scmp.ge.s32.totalorder %s606_s15, 2  ;;  %s317_s20 = scalar_lea.sflag [#allocation4], %s316_s18 }
 0x143   : > { %p432_p3 = pnand %p855_p13, %p854_p10 }
 0x145   : > { %589 = dma.done.wait (!%p432_p3), %s317_s20, 128  }
 0x146   : > { %591 = vsyncadd (!%p432_p3), %s317_s20, 4294967168  ;;  %p17_p7 = scmp.ge.s32.totalorder %s693_s24, 4   ;;  %s856_s12 = smov %s598_s13 }
 0x147   : > { %s857_s13 = smov %s602_s14  ;;  %s858_s14 = smov %s724_s17 }
 0x148   : > { %s859_s15 = smov %s693_s24  ;;  %19 = sbr.rel (!%p17_p7) target bundleno = 6 (0x6), region = 81 }
 0x14f   :  { %322 = vsyncpa [#allocation3], 1 }
 0x150   :  { %324 = vsyncpa [#allocation3 + $0x1], 1 }
 0x151   :  { %325 = vsyncpa [#allocation6], 1 }
 0x152   :  { %326 = vsyncpa [#allocation4], 1 }
 0x153   :  { %328 = vsyncpa [#allocation4 + $0x1], 1 }

</bundles_post_ra>
